<compile_context>
chip_gen: v6e
topology: v6e:2x2x1
jax: 0.10.0
libtpu: 0.0.40
codegen_flags: <defaults>
</compile_context>

<pallas_src>
import functools

import jax
import jax.numpy as jnp
from jax.experimental import pallas as pl
from jax.experimental.pallas import tpu as pltpu

INPUT_SIZE = 3
HIDDEN_SIZE = 60
OUTPUT_SIZE = 2

LANE = 128          # TPU lane width
CHUNK = 512         # in-kernel lane chunk: h stays (60, 512) ~= 32 vregs
SMALL_BATCH = 256   # below this a single grid-free block is cheapest


def _round_up(n, m):
    return ((n + m - 1) // m) * m


def _make_encoder_kernel(num_chunks, chunk):
    """Kernel factory.  Block layout is batch-last (lane-dense):
         x_ref : (IN, TILE)       w1_ref: (HIDDEN, IN)   b1_ref: (HIDDEN, 1)
         w2_ref: (OUT, HIDDEN)    b2_ref: (OUT, 1)       o_ref : (OUT, TILE)
    """
    highest = jax.lax.Precision.HIGHEST

    def mlp(xc, w1, b1, w2, b2):
        # fc1 on the MXU: K=3 is tiny, but the MXU/vex slot is otherwise idle
        # and this removes ~6 VPU ops/element vs. the outer-product version.
        h = jnp.dot(w1, xc, preferred_element_type=jnp.float32,
                    precision=highest)                    # (HIDDEN, chunk)
        h = jnp.maximum(h + b1, 0.0)                      # only 2 VPU passes
        y = jnp.dot(w2, h, preferred_element_type=jnp.float32,
                    precision=highest)                    # (OUT, chunk)
        return y + b2                                     # tiny (2 sublanes)

    def kernel(x_ref, w1_ref, b1_ref, w2_ref, b2_ref, o_ref):
        w1 = w1_ref[...]
        b1 = b1_ref[...]
        w2 = w2_ref[...]
        b2 = b2_ref[...]

        if num_chunks == 1:
            o_ref[...] = mlp(x_ref[...], w1, b1, w2, b2).astype(o_ref.dtype)
        else:
            # Big DMA block outside, small compute chunk inside: bounds vreg
            # pressure so the (60, chunk) activation never spills to VMEM.
            def body(c, carry):
                start = pl.multiple_of(c * chunk, chunk)
                xc = x_ref[:, pl.ds(start, chunk)]
                o_ref[:, pl.ds(start, chunk)] = mlp(
                    xc, w1, b1, w2, b2).astype(o_ref.dtype)
                return carry

            jax.lax.fori_loop(0, num_chunks, body, None, unroll=True)

    return kernel


def _pick_tile(batch, block_b):
    """Returns (tile_lanes, chunk_lanes), or None for the grid-free path."""
    if batch < SMALL_BATCH:
        return None
    block_b = max(CHUNK, _round_up(block_b, CHUNK))
    # Always >= 2 blocks when tiling (keeps both v7x TensorCores busy).
    num_pairs = max(1, -(-batch // (2 * block_b)))
    tile = _round_up(-(-batch // (2 * num_pairs)), LANE)
    if tile >= CHUNK:
        return min(_round_up(tile, CHUNK), block_b), CHUNK
    return tile, tile


def _vmem_limit_bytes(tile):
    # Double-buffered, sublane-padded (8, tile) f32 in and out blocks, plus
    # tiny weights and compiler scratch headroom (v7x-safe: well under 64 MiB).
    io_bytes = 2 * 2 * (8 * tile * 4)
    return min(64 * 1024 * 1024, io_bytes + (8 << 20))


def _encoder_pallas(x_t, w1, b1c, w2, b2c, block_b):
    batch = x_t.shape[1]
    out_shape = jax.ShapeDtypeStruct((OUTPUT_SIZE, batch), jnp.float32)
    cost = pl.CostEstimate(
        flops=2 * batch * (INPUT_SIZE * HIDDEN_SIZE
                           + HIDDEN_SIZE * OUTPUT_SIZE)
              + batch * (HIDDEN_SIZE + OUTPUT_SIZE),
        transcendentals=0,
        bytes_accessed=4 * (batch * (INPUT_SIZE + OUTPUT_SIZE)
                            + HIDDEN_SIZE * (INPUT_SIZE + 1)
                            + OUTPUT_SIZE * (HIDDEN_SIZE + 1)),
    )

    tiling = _pick_tile(batch, block_b)
    if tiling is None:
        # Small batch: whole problem in one VMEM block, no grid machinery.
        kernel = _make_encoder_kernel(num_chunks=1, chunk=batch)
        return pl.pallas_call(kernel, out_shape=out_shape,
                              cost_estimate=cost)(x_t, w1, b1c, w2, b2c)

    tile, chunk = tiling
    num_blocks = pl.cdiv(batch, tile)     # ragged last block: Pallas masks it
    kernel = _make_encoder_kernel(num_chunks=tile // chunk, chunk=chunk)
    return pl.pallas_call(
        kernel,
        out_shape=out_shape,
        grid=(num_blocks,),
        in_specs=[
            pl.BlockSpec((INPUT_SIZE, tile), lambda i: (0, i)),
            pl.BlockSpec((HIDDEN_SIZE, INPUT_SIZE), lambda i: (0, 0)),
            pl.BlockSpec((HIDDEN_SIZE, 1), lambda i: (0, 0)),
            pl.BlockSpec((OUTPUT_SIZE, HIDDEN_SIZE), lambda i: (0, 0)),
            pl.BlockSpec((OUTPUT_SIZE, 1), lambda i: (0, 0)),
        ],
        out_specs=pl.BlockSpec((OUTPUT_SIZE, tile), lambda i: (0, i)),
        compiler_params=pltpu.CompilerParams(
            dimension_semantics=("parallel",),
            vmem_limit_bytes=_vmem_limit_bytes(tile),
        ),
        cost_estimate=cost,
    )(x_t, w1, b1c, w2, b2c)


@functools.partial(jax.jit, static_argnames=("block_b",))
def encoder_forward_t(x_t, w1, b1, w2, b2, *, block_b=8192):
    """Zero-copy batch-last API.  x_t: (IN, B) f32 -> (OUT, B) f32.
    Weights in PyTorch layout: w1 (HIDDEN, IN), b1 (HIDDEN,),
    w2 (OUT, HIDDEN), b2 (OUT,)."""
    return _encoder_pallas(x_t, w1, b1.reshape(HIDDEN_SIZE, 1),
                           w2, b2.reshape(OUTPUT_SIZE, 1), block_b)


@functools.partial(jax.jit, static_argnames=("block_b",))
def encoder_forward(x, w1, b1, w2, b2, *, block_b=8192):
    """PyTorch-layout convenience API: x (B, IN) -> (B, OUT).  The boundary
    transposes are fused into this jit; prefer encoder_forward_t to avoid
    them entirely."""
    y_t = _encoder_pallas(x.T, w1, b1.reshape(HIDDEN_SIZE, 1),
                          w2, b2.reshape(OUTPUT_SIZE, 1), block_b)
    return y_t.T


def init_params(key):
    # Mimics nn.Linear's default U(-1/sqrt(fan_in), 1/sqrt(fan_in)); PyTorch layout.
    k1, k2, k3, k4 = jax.random.split(key, 4)
    bound1 = 1.0 / (INPUT_SIZE ** 0.5)
    bound2 = 1.0 / (HIDDEN_SIZE ** 0.5)
    w1 = jax.random.uniform(k1, (HIDDEN_SIZE, INPUT_SIZE), jnp.float32,
                            -bound1, bound1)
    b1 = jax.random.uniform(k2, (HIDDEN_SIZE,), jnp.float32, -bound1, bound1)
    w2 = jax.random.uniform(k3, (OUTPUT_SIZE, HIDDEN_SIZE), jnp.float32,
                            -bound2, bound2)
    b2 = jax.random.uniform(k4, (OUTPUT_SIZE,), jnp.float32, -bound2, bound2)
    return w1, b1, w2, b2


def reference_forward(x, w1, b1, w2, b2):
    h = jnp.maximum(jnp.dot(x, w1.T, precision="highest") + b1, 0.0)
    return jnp.dot(h, w2.T, precision="highest") + b2


if __name__ == "__main__":
    key = jax.random.PRNGKey(0)
    k_params, k1, k2, k3 = jax.random.split(key, 4)
    w1, b1, w2, b2 = init_params(k_params)

    # 1) Small batch -> single grid-free block.
    x_small = jax.random.normal(k1, (8, INPUT_SIZE), jnp.float32)
    out_small = jax.block_until_ready(encoder_forward(x_small, w1, b1, w2, b2))
    ref_small = reference_forward(x_small, w1, b1, w2, b2)
    assert out_small.shape == (8, OUTPUT_SIZE)
    assert jnp.allclose(out_small, ref_small, atol=1e-4, rtol=1e-4)

    # 2) Larger ragged batch -> 2 "parallel" grid blocks (tile 1024),
    #    2 unrolled 512-lane chunks per block, un-padded ragged last block.
    bsz = 1600
    x_big = jax.random.normal(k2, (bsz, INPUT_SIZE), jnp.float32)
    out_big = jax.block_until_ready(encoder_forward(x_big, w1, b1, w2, b2))
    ref_big = reference_forward(x_big, w1, b1, w2, b2)
    assert out_big.shape == (bsz, OUTPUT_SIZE)
    assert jnp.allclose(out_big, ref_big, atol=1e-4, rtol=1e-4)

    # 3) Zero-copy batch-last API (no transposes anywhere).
    bsz_t = 640
    x_t = jax.random.normal(k3, (INPUT_SIZE, bsz_t), jnp.float32)
    out_t = jax.block_until_ready(encoder_forward_t(x_t, w1, b1, w2, b2))
    ref_t = reference_forward(x_t.T, w1, b1, w2, b2).T
    assert out_t.shape == (OUTPUT_SIZE, bsz_t)
    assert jnp.allclose(out_t, ref_t, atol=1e-4, rtol=1e-4)

    print("KERNEL_OK")
</pallas_src>

<mosaic_0001>
module attributes {stable_mosaic.version = 11 : i64} {
  func.func @kernel(%arg0: memref<3x8xf32, #tpu.memory_space<vmem>>, %arg1: memref<60x3xf32, #tpu.memory_space<vmem>>, %arg2: memref<60x1xf32, #tpu.memory_space<vmem>>, %arg3: memref<2x60xf32, #tpu.memory_space<vmem>>, %arg4: memref<2x1xf32, #tpu.memory_space<vmem>>, %arg5: memref<2x8xf32, #tpu.memory_space<vmem>>) attributes {dimension_semantics = [], scalar_prefetch = 0 : i64, scratch_operands = 0 : i64, tpu.core_type = #tpu.core_type<tc>} {
    %c0 = arith.constant 0 : index
    %c0_0 = arith.constant 0 : index
    %0 = vector.load %arg1[%c0, %c0_0] : memref<60x3xf32, #tpu.memory_space<vmem>>, vector<60x3xf32>
    %c0_1 = arith.constant 0 : index
    %c0_2 = arith.constant 0 : index
    %1 = vector.load %arg2[%c0_1, %c0_2] : memref<60x1xf32, #tpu.memory_space<vmem>>, vector<60x1xf32>
    %c0_3 = arith.constant 0 : index
    %c0_4 = arith.constant 0 : index
    %2 = vector.load %arg3[%c0_3, %c0_4] : memref<2x60xf32, #tpu.memory_space<vmem>>, vector<2x60xf32>
    %c0_5 = arith.constant 0 : index
    %c0_6 = arith.constant 0 : index
    %3 = vector.load %arg4[%c0_5, %c0_6] : memref<2x1xf32, #tpu.memory_space<vmem>>, vector<2x1xf32>
    %c0_7 = arith.constant 0 : index
    %c0_8 = arith.constant 0 : index
    %4 = vector.load %arg0[%c0_7, %c0_8] : memref<3x8xf32, #tpu.memory_space<vmem>>, vector<3x8xf32>
    %cst = arith.constant dense<0.000000e+00> : vector<60x8xf32>
    %5 = tpu.matmul %0, %4, %cst {dimension_numbers = #tpu.dot_dimension_numbers<[1], [0], [0], [1], [0, 0, 1, 1], [], []>, precision = #tpu.contract_precision<fp32>} : vector<60x3xf32>, vector<3x8xf32>, vector<60x8xf32> -> vector<60x8xf32>
    %6 = vector.broadcast %1 : vector<60x1xf32> to vector<60x8xf32>
    %7 = arith.addf %5, %6 : vector<60x8xf32>
    %cst_9 = arith.constant 0.000000e+00 : f32
    %8 = vector.broadcast %cst_9 : f32 to vector<60x8xf32>
    %9 = arith.maximumf %7, %8 : vector<60x8xf32>
    %cst_10 = arith.constant dense<0.000000e+00> : vector<2x8xf32>
    %10 = tpu.matmul %2, %9, %cst_10 {dimension_numbers = #tpu.dot_dimension_numbers<[1], [0], [0], [1], [0, 0, 1, 1], [], []>, precision = #tpu.contract_precision<fp32>} : vector<2x60xf32>, vector<60x8xf32>, vector<2x8xf32> -> vector<2x8xf32>
    %11 = vector.broadcast %3 : vector<2x1xf32> to vector<2x8xf32>
    %12 = arith.addf %10, %11 : vector<2x8xf32>
    %c0_11 = arith.constant 0 : index
    %c0_12 = arith.constant 0 : index
    %13 = vector.load %arg5[%c0_11, %c0_12] : memref<2x8xf32, #tpu.memory_space<vmem>>, vector<2x8xf32>
    tpu.vector_store %arg5[%c0_11, %c0_12], %12 {strides = array<i32>} : memref<2x8xf32, #tpu.memory_space<vmem>>, vector<2x8xf32>,
    return
  }
}

</mosaic_0001>

<bundles_post_ra>
// kernel: encoder_forward.1
= control target key start
LH: loop header
LB: loop body
LE: loop exit
PB: predicated region body
PF: predicated region fallthrough
CT: control target
= control target key end

     0   :  { %vm105_vm0 = vcmask 1042432   ;;  %vm80_vm1 = vcmask 23552   ;;  %s2187_s0 = inlined_call_operand.vmem [shape: f32[3,8], index: 0, kind: input, shape index: {}]   ;;  %s2188_s1 = inlined_call_operand.vmem [shape: f32[60,3], index: 1, kind: input, shape index: {}]   ;;  %s2189_s2 = inlined_call_operand.vmem [shape: f32[60,1], index: 2, kind: input, shape index: {}]   ;;  %s2190_s3 = inlined_call_operand.vmem [shape: f32[2,60], index: 3, kind: input, shape index: {}]   ;;  %s2191_s4 = inlined_call_operand.vmem [shape: f32[2,1], index: 4, kind: input, shape index: {}]   ;;  %s2192_s5 = inlined_call_operand.hbm [shape: f32[2,8], index: 5, kind: output, shape index: {}]  }
   0x1   :  { %v39_v0 = vld [vmem:[%s2187_s0] sm:$0x7]  ;;  %v22_v2 = vld [vmem:[%s2188_s1 + $0x8] sm:$0xff]  ;;  %v23_v6 = vld [vmem:[%s2188_s1 + $0x10] sm:$0xff] }
   0x2   :  { %v21_v1 = vld [vmem:[%s2188_s1] sm:$0xff]  ;;  %v107_v3 = vsel %vm105_vm0, %v39_v0, 0  ;;  %v85_v5 = vsel %vm80_vm1, %v22_v2, 0  ;;  %v24_v7 = vld [vmem:[%s2188_s1 + $0x18] sm:$0xff]  ;;  %v88_v12 = vsel %vm80_vm1, %v23_v6, 0  ;;  %v26_v13 = vld [vmem:[%s2188_s1 + $0x28] sm:$0xff] }
   0x3   :  { %v82_v4 = vsel %vm80_vm1, %v21_v1, 0  ;;  %v25_v8 = vld [vmem:[%s2188_s1 + $0x20] sm:$0xff]  ;;  %v1818_v9 = vand.u32 4294901760, %v107_v3  ;;  %v1822_v11 = vand.u32 4294901760, %v85_v5  ;;  %v27_v14 = vld [vmem:[%s2188_s1 + $0x30] sm:$0xff]  ;;  %v1831_v15 = vand.u32 4294901760, %v88_v12 }
   0x4   :  { %v1820_v10 = vand.u32 4294901760, %v82_v4  ;;  %v91_v16 = vsel %vm80_vm1, %v24_v7, 0  ;;  %v94_v17 = vsel %vm80_vm1, %v25_v8, 0  ;;  %v97_v18 = vsel %vm80_vm1, %v26_v13, 0 }
   0x5   :  { %1538 = vmatprep.subr.mxu0 %v1818_v9  ;;  %v287_v20 = vsub.f32 %v107_v3, %v1818_v9  ;;  %v1842_v21 = vsub.f32 %v85_v5, %v1822_v11  ;;  %v1845_v22 = vand.u32 4294901760, %v91_v16  ;;  %v1849_v23 = vsub.f32 %v88_v12, %v1831_v15 }
   0x6   :  { %v1838_v19 = vsub.f32 %v82_v4, %v1820_v10  ;;  %1554 = vmatprep.mubr.f32.mxu1 %v1820_v10  ;;  %1539 = vmatpush3.msra.mxu0 %v1818_v9  ;;  %v1851_v24 = vand.u32 4294901760, %v94_v17  ;;  %v1853_v25 = vand.u32 4294901760, %v97_v18  ;;  %v100_v26 = vsel %vm80_vm1, %v27_v14, 0 }
   0x7   :  { %v1857_v28 = vand.u32 4294901760, %v287_v20  ;;  %1566 = vmatprep.subr.mxu0 %v287_v20  ;;  %v187_v29 = vand.u32 4294901760, %v1842_v21  ;;  %v1861_v30 = vsub.f32 %v91_v16, %v1845_v22  ;;  %v197_v31 = vand.u32 4294901760, %v1849_v23 }
   0x8   :  { %v177_v27 = vand.u32 4294901760, %v1838_v19  ;;  %v1865_v32 = vsub.f32 %v94_v17, %v1851_v24  ;;  %v1868_v33 = vsub.f32 %v97_v18, %v1853_v25  ;;  %v1870_v34 = vand.u32 4294901760, %v100_v26 }
   0x9   :  { %10 = vsyncpa [#allocation3], 0  ;;  %v289_v36 = vsub.f32 %v287_v20, %v1857_v28  ;;  %v188_v37 = vsub.f32 %v1842_v21, %v187_v29  ;;  %v207_v38 = vand.u32 4294901760, %v1861_v30  ;;  %v198_v39 = vsub.f32 %v1849_v23, %v197_v31  ;;  %v28_v43 = vld [vmem:[%s2188_s1 + $0x38] sm:$0xf]  ;;  %v34_v0 = vld [vmem:[%s2189_s2 + $0x28] sm:$0xff] }
   0xa   :  { %v178_v35 = vsub.f32 %v1838_v19, %v177_v27  ;;  %v217_v40 = vand.u32 4294901760, %v1865_v32  ;;  %v227_v41 = vand.u32 4294901760, %v1868_v33  ;;  %v1886_v42 = vsub.f32 %v100_v26, %v1870_v34  ;;  %v36_v61 = vld [vmem:[%s2189_s2 + $0x38] sm:$0xf]  ;;  %v35_v2 = vld [vmem:[%s2189_s2 + $0x30] sm:$0xff]  ;;  %v33_v3 = vld [vmem:[%s2189_s2 + $0x20] sm:$0xff] }
   0xb   :  { %v290_v45 = vand.u32 4294901760, %v289_v36  ;;  %v189_v46 = vand.u32 4294901760, %v188_v37  ;;  %v208_v47 = vsub.f32 %v1861_v30, %v207_v38  ;;  %v199_v48 = vand.u32 4294901760, %v198_v39  ;;  %v32_v4 = vld [vmem:[%s2189_s2 + $0x18] sm:$0xff]  ;;  %v31_v5 = vld [vmem:[%s2189_s2 + $0x10] sm:$0xff]  ;;  %v30_v6 = vld [vmem:[%s2189_s2 + $0x8] sm:$0xff] }
   0xc   :  { %v179_v44 = vand.u32 4294901760, %v178_v35  ;;  %v218_v49 = vsub.f32 %v1865_v32, %v217_v40  ;;  %v237_v50 = vand.u32 4294901760, %v1886_v42  ;;  %v103_v51 = vsel %vm80_vm1, %v28_v43, 0  ;;  %v29_v7 = vld [vmem:[%s2189_s2] sm:$0xff] }
   0xd   :  { %1552 = vmatprep.subr.mxu1 %v290_v45  ;;  %v209_v52 = vand.u32 4294901760, %v208_v47  ;;  %v228_v53 = vsub.f32 %v1868_v33, %v227_v41  ;;  %v1902_v54 = vand.u32 4294901760, %v103_v51  ;;  %v1764_v63 = vmov 0   ;;  %v38_v8 = vld [vmem:[%s2191_s4] sm:$0x3] }
   0xe   :  { %1540 = vmatprep.mubr.f32.mxu0 %v179_v44  ;;  %1553 = vmatpush3.msra.mxu1 %v290_v45  ;;  %v219_v55 = vand.u32 4294901760, %v218_v49  ;;  %v238_v56 = vsub.f32 %v1886_v42, %v237_v50  ;;  %vm1766_vm2 = vmmov 0   ;;  %vm869_vm3 = vcmask 490496  }
   0xf   :  { %1541 = vmatmul.mubr.f32.vlgmr.msra.gmra.mxu0 %v189_v46  ;;  %1555 = vmatmul.mubr.f32.vlgmr.msra.gmra.mxu1 %v1822_v11  ;;  %v246_v57 = vsub.f32 %v103_v51, %v1902_v54  ;;  %v229_v58 = vand.u32 4294901760, %v228_v53  ;;  %vm873_vm4 = vcmask 1043456   ;;  %vm1414_vm5 = vcmask 58368  }
  0x10   :  { %1567 = vmatpush3.msra.mxu0 %v287_v20  ;;  %1580 = vmatprep.subr.mxu1 %v1818_v9  ;;  %v239_v60 = vand.u32 4294901760, %v238_v56 }
  0x11   :  { %1543 = vmatprep.mubr.f32.mxu0 %v199_v48  ;;  %1581 = vmatpush3.msra.mxu1 %v1818_v9  ;;  %v247_v59 = vand.u32 4294901760, %v246_v57 }
  0x12   :  { %1557 = vmatprep.mubr.f32.mxu1 %v1831_v15  ;;  %1594 = vmatprep.subr.mxu0 %v1857_v28 }
  0x13   :  { %1544 = vmatmul.mubr.f32.gmra.mxu0 %v209_v52  ;;  %1558 = vmatmul.mubr.f32.gmra.mxu1 %v1845_v22  ;;  %v248_v62 = vsub.f32 %v246_v57, %v247_v59 }
  0x14   :  { %1546 = vmatprep.mubr.f32.mxu0 %v219_v55  ;;  %1560 = vmatprep.mubr.f32.mxu1 %v1851_v24 }
  0x15   :  { %1608 = vmatprep.subr.mxu1 %v1818_v9  ;;  %1740 = vset.pattern.permute.xlu0 %v1764_v63  ;;  %v249_v1 = vand.u32 4294901760, %v248_v62 }
  0x16   :  { %1741 = vset.pattern.permute.xlu1 %v1764_v63  ;;  %77 = vperm.xlu0 %1740, %v36_v61  }
  0x17   :  { %1547 = vmatmul.mubr.f32.gmra.mxu0 %v229_v58  ;;  %1561 = vmatmul.mubr.f32.gmra.mxu1 %v1853_v25 }
  0x18   :  { %1549 = vmatprep.mubr.f32.mxu0 %v239_v60  ;;  %1563 = vmatprep.mubr.f32.mxu1 %v1870_v34 }
  0x19   :  { %67 = vperm.xlu1 %1741, %v34_v0  }
  0x1a   :  { %72 = vperm.xlu0 %1740, %v35_v2  }
  0x1b   :  { %1550 = vmatmul.mubr.f32.gmra.mxu0 %v249_v1  ;;  %1564 = vmatmul.mubr.f32.gmra.mxu1 %v1902_v54 }
  0x1c   :  { %1568 = vmatprep.mubr.f32.mxu0 %v1838_v19  ;;  %1582 = vmatprep.mubr.f32.mxu1 %v177_v27 }
  0x1d   :  { %62 = vperm.xlu1 %1741, %v33_v3  }
  0x1e   :  { %57 = vperm.xlu0 %1740, %v32_v4  }
  0x1f   :  { %1569 = vmatmul.mubr.f32.vlgmr.msra.gmra.mxu0 %v1842_v21  ;;  %1583 = vmatmul.mubr.f32.vlgmr.msra.gmra.mxu1 %v187_v29 }
  0x20   :  { %1595 = vmatpush3.msra.mxu0 %v1857_v28  ;;  %1609 = vmatpush3.msra.mxu1 %v1818_v9  ;;  %v1765_v9 = vmov 0.0  }
  0x21   :  { %1571 = vmatprep.mubr.f32.mxu0 %v1849_v23  ;;  %1585 = vmatprep.mubr.f32.mxu1 %v197_v31 }
  0x22   :  { %52 = vperm.xlu1 %1741, %v31_v5   ;;  %47 = vperm.xlu0 %1740, %v30_v6  }
  0x23   :  { %1572 = vmatmul.mubr.f32.gmra.mxu0 %v1861_v30  ;;  %1586 = vmatmul.mubr.f32.gmra.mxu1 %v207_v38 }
  0x24   :  { %1574 = vmatprep.mubr.f32.mxu0 %v1865_v32  ;;  %1588 = vmatprep.mubr.f32.mxu1 %v217_v40 }
  0x25   :  { %1622 = vmatprep.subr.mxu0 %v1765_v9  ;;  %1641 = vmatprep.subr.mxu1 %v1765_v9 }
  0x26   :  { %42 = vperm.xlu1 %1741, %v29_v7   ;;  %866 = vperm.xlu0 %1740, %v38_v8  }
  0x27   :  { %1575 = vmatmul.mubr.f32.gmra.mxu0 %v1868_v33  ;;  %1589 = vmatmul.mubr.f32.gmra.mxu1 %v227_v41 }
  0x28   :  { %1577 = vmatprep.mubr.f32.mxu0 %v1886_v42  ;;  %1591 = vmatprep.mubr.f32.mxu1 %v237_v50 }
  0x2b   :  { %1578 = vmatmul.mubr.f32.gmra.mxu0 %v246_v57  ;;  %1592 = vmatmul.mubr.f32.gmra.mxu1 %v247_v59 }
  0x2c   :  { %1596 = vmatprep.mubr.f32.mxu0 %v1820_v10  ;;  %1610 = vmatprep.mubr.f32.mxu1 %v1820_v10 }
  0x2f   :  { %1597 = vmatmul.mubr.f32.vlgmr.msra.gmra.mxu0 %v1822_v11  ;;  %1611 = vmatmul.mubr.f32.vlgmr.msra.gmra.mxu1 %v1822_v11 }
  0x30   :  { %1599 = vmatprep.mubr.f32.mxu0 %v1831_v15  ;;  %1613 = vmatprep.mubr.f32.mxu1 %v1831_v15 }
  0x33   :  { %1600 = vmatmul.mubr.f32.gmra.mxu0 %v1845_v22  ;;  %1614 = vmatmul.mubr.f32.gmra.mxu1 %v1845_v22 }
  0x34   :  { %1602 = vmatprep.mubr.f32.mxu0 %v1851_v24  ;;  %1616 = vmatprep.mubr.f32.mxu1 %v1851_v24 }
  0x37   :  { %1603 = vmatmul.mubr.f32.gmra.mxu0 %v1853_v25  ;;  %1617 = vmatmul.mubr.f32.gmra.mxu1 %v1853_v25 }
  0x38   :  { %1605 = vmatprep.mubr.f32.mxu0 %v1870_v34  ;;  %1619 = vmatprep.mubr.f32.mxu1 %v1870_v34 }
  0x3b   :  { %1606 = vmatmul.mubr.f32.gmra.mxu0 %v1902_v54  ;;  %1620 = vmatmul.mubr.f32.gmra.mxu1 %v1902_v54 }
  0x3c   :  { %1638 = vmatprep.mubr.msk.f32.mxu0 %vm1766_vm2, %v1765_v9  ;;  %1657 = vmatprep.mubr.msk.f32.mxu1 %vm1766_vm2, %v1765_v9 }
  0x91   :  { %v78_v21 = vpop.permute.xlu0 %77 }
  0x94   :  { %v68_v23 = vpop.permute.xlu1 %67 }
  0x95   :  { %v73_v29 = vpop.permute.xlu0 %72 }
  0x98   :  { %v63_v31 = vpop.permute.xlu1 %62 }
  0x99   :  { %v58_v37 = vpop.permute.xlu0 %57 }
  0x9d   :  { %v53_v39 = vpop.permute.xlu1 %52  ;;  %v48_v45 = vpop.permute.xlu0 %47 }
  0xa1   :  { %v43_v48 = vpop.permute.xlu1 %42 }
  0xcf   :  { %v1542_v10 = vpop.f32.mrf.mxu0  ;;  %v1556_v11 = vpop.f32.mrf.mxu1 }
  0xd0   :  { %v192_v53 = vadd.f32 %v1542_v10, %v48_v45 }
  0xd1   :  { %v181_v12 = vpop.f32.mrf.mxu0  ;;  %v327_v13 = vpop.f32.mrf.mxu1 }
  0xd2   :  { %v182_v56 = vadd.f32 %v181_v12, %v43_v48  ;;  %v334_v2 = vadd.f32 %v1556_v11, %v192_v53 }
  0xd3   :  { %v1545_v14 = vpop.f32.mrf.mxu0  ;;  %v1559_v15 = vpop.f32.mrf.mxu1 }
  0xd4   :  { %v212_v46 = vadd.f32 %v1545_v14, %v58_v37  ;;  %v328_v6 = vadd.f32 %v327_v13, %v182_v56 }
  0xd5   :  { %v201_v16 = vpop.f32.mrf.mxu0  ;;  %v339_v17 = vpop.f32.mrf.mxu1 }
  0xd6   :  { %v202_v51 = vadd.f32 %v201_v16, %v53_v39  ;;  %v346_v57 = vadd.f32 %v1559_v15, %v212_v46 }
  0xd7   :  { %v1548_v18 = vpop.f32.mrf.mxu0  ;;  %v1562_v19 = vpop.f32.mrf.mxu1 }
  0xd8   :  { %v232_v49 = vadd.f32 %v1548_v18, %v68_v23  ;;  %v340_v62 = vadd.f32 %v339_v17, %v202_v51 }
  0xd9   :  { %v221_v20 = vpop.f32.mrf.mxu0  ;;  %v351_v22 = vpop.f32.mrf.mxu1 }
  0xda   :  { %v222_v54 = vadd.f32 %v221_v20, %v63_v31  ;;  %v358_v59 = vadd.f32 %v1562_v19, %v232_v49 }
  0xdb   :  { %v1551_v24 = vpop.f32.mrf.mxu0  ;;  %v1565_v25 = vpop.f32.mrf.mxu1 }
  0xdc   :  { %v252_v60 = vadd.f32 %v1551_v24, %v78_v21  ;;  %v352_v3 = vadd.f32 %v351_v22, %v222_v54 }
  0xdd   :  { %v241_v26 = vpop.f32.mrf.mxu0  ;;  %v363_v27 = vpop.f32.mrf.mxu1 }
  0xde   :  { %v242_v63 = vadd.f32 %v241_v26, %v73_v29  ;;  %v370_v10 = vadd.f32 %v1565_v25, %v252_v60 }
  0xdf   :  { %v1570_v28 = vpop.f32.mrf.mxu0  ;;  %v1584_v30 = vpop.f32.mrf.mxu1 }
  0xe0   :  { %v451_v14 = vadd.f32 %v1570_v28, %v334_v2  ;;  %v364_v15 = vadd.f32 %v363_v27, %v242_v63 }
  0xe1   :  { %v443_v32 = vpop.f32.mrf.mxu0  ;;  %v566_v33 = vpop.f32.mrf.mxu1 }
  0xe2   :  { %v444_v18 = vadd.f32 %v443_v32, %v328_v6  ;;  %v575_v29 = vadd.f32 %v1584_v30, %v451_v14 }
  0xe3   :  { %v1573_v34 = vpop.f32.mrf.mxu0  ;;  %v1587_v35 = vpop.f32.mrf.mxu1 }
  0xe4   :  { %v465_v0 = vadd.f32 %v1573_v34, %v346_v57 }
  0xe5   :  { %v457_v36 = vpop.f32.mrf.mxu0  ;;  %v582_v38 = vpop.f32.mrf.mxu1 }
  0xe6   :  { %v458_v7 = vadd.f32 %v457_v36, %v340_v62  ;;  %v591_v19 = vadd.f32 %v1587_v35, %v465_v0  ;;  %v567_v36 = vadd.f32 %v566_v33, %v444_v18 }
  0xe7   :  { %v1576_v40 = vpop.f32.mrf.mxu0  ;;  %v1590_v41 = vpop.f32.mrf.mxu1 }
  0xe8   :  { %v479_v4 = vadd.f32 %v1576_v40, %v358_v59  ;;  %v583_v24 = vadd.f32 %v582_v38, %v458_v7  ;;  %v37_v38 = vld [vmem:[%s2190_s3] sm:$0x3]  ;;  %s1767_s3 = smov [#allocation2]  }
  0xe9   :  { %v471_v42 = vpop.f32.mrf.mxu0  ;;  %v598_v43 = vpop.f32.mrf.mxu1  ;;  %s1422_s26 = sshll.u32 %s1767_s3, 4  ;;  %s1423_s26 = int_to_ptr.vmem [resolvable:$true] %s1422_s26 }
  0xea   :  { %v472_v16 = vadd.f32 %v471_v42, %v352_v3  ;;  %v607_v21 = vadd.f32 %v1590_v41, %v479_v4  ;;  %s1742_s27 = scalar_lea.vmem %s1423_s26, 32  ;;  %p1747_p1 = scmp.lt.s32.totalorder %s1423_s26, %s1423_s26 }
  0xeb   :  { %v1579_v44 = vpop.f32.mrf.mxu0  ;;  %v1593_v47 = vpop.f32.mrf.mxu1  ;;  %p1743_p0 = scmp.ne.s32.totalorder %s1423_s26, %s1742_s27  ;;  %p1748_p2 = scmp.lt.s32.totalorder %s1742_s27, %s1742_s27 }
  0xec   :  { %v493_v17 = vadd.f32 %v1579_v44, %v370_v10  ;;  %v599_v31 = vadd.f32 %v598_v43, %v472_v16 }
  0xed   :  { %v485_v50 = vpop.f32.mrf.mxu0  ;;  %v614_v52 = vpop.f32.mrf.mxu1  ;;  %p1749_p3 = por %p1748_p2, %p1747_p1 }
  0xee   :  { %v486_v26 = vadd.f32 %v485_v50, %v364_v15  ;;  %v623_v37 = vadd.f32 %v1593_v47, %v493_v17  ;;  %v871_v47 = vsel %vm869_vm3, %v37_v38, 0 }
  0xef   :  { %v1598_v55 = vpop.f32.mrf.mxu0  ;;  %v1612_v58 = vpop.f32.mrf.mxu1  ;;  %v1997_v59 = vand.u32 4294901760, %v871_v47  ;;  %p1750_p4 = pnand %p1749_p3, %p1743_p0 }
  0xf0   :  { %v703_v27 = vadd.f32 %v1598_v55, %v575_v29  ;;  %v615_v40 = vadd.f32 %v614_v52, %v486_v26 }
  0xf1   :  { %v696_v61 = vpop.f32.mrf.mxu0  ;;  %v810_v1 = vpop.f32.mrf.mxu1 }
  0xf2   :  { %v697_v30 = vadd.f32 %v696_v61, %v567_v36  ;;  %v817_v50 = vadd.f32 %v1612_v58, %v703_v27 }
  0xf3   :  { %v1601_v5 = vpop.f32.mrf.mxu0  ;;  %v1615_v8 = vpop.f32.mrf.mxu1 }
  0xf4   :  { %v715_v11 = vadd.f32 %v1601_v5, %v591_v19  ;;  %v811_v56 = vadd.f32 %v810_v1, %v697_v30  ;;  %v857_v63 = vmax.f32 %v817_v50, 0.0  ;;  %v2011_v1 = vsub.f32 %v871_v47, %v1997_v59 }
  0xf5   :  { %v708_v12 = vpop.f32.mrf.mxu0  ;;  %v822_v20 = vpop.f32.mrf.mxu1 }
  0xf6   :  { %v709_v25 = vadd.f32 %v708_v12, %v583_v24  ;;  %v829_v41 = vadd.f32 %v1615_v8, %v715_v11  ;;  %v856_v5 = vmax.f32 %v811_v56, 0.0  ;;  %v2025_v14 = vand.u32 4294901760, %v857_v63 }
  0xf7   :  { %v1604_v23 = vpop.f32.mrf.mxu0  ;;  %v1618_v22 = vpop.f32.mrf.mxu1 }
  0xf8   :  { %v727_v13 = vadd.f32 %v1604_v23, %v607_v21  ;;  %v823_v46 = vadd.f32 %v822_v20, %v709_v25  ;;  %v859_v54 = vmax.f32 %v829_v41, 0.0  ;;  %v2035_v19 = vand.u32 4294901760, %v856_v5 }
  0xf9   :  { %v720_v34 = vpop.f32.mrf.mxu0  ;;  %v834_v28 = vpop.f32.mrf.mxu1  ;;  %v952_v20 = vand.u32 4294901760, %v2011_v1  ;;  %v2051_v26 = vsub.f32 %v857_v63, %v2025_v14 }
  0xfa   :  { %v841_v32 = vadd.f32 %v1618_v22, %v727_v13  ;;  %v721_v35 = vadd.f32 %v720_v34, %v599_v31  ;;  %v858_v60 = vmax.f32 %v823_v46, 0.0  ;;  %v2001_v2 = vand.u32 4294901760, %v859_v54 }
  0xfb   :  { %v1607_v39 = vpop.f32.mrf.mxu0  ;;  %v1621_v42 = vpop.f32.mrf.mxu1  ;;  %v953_v13 = vsub.f32 %v2011_v1, %v952_v20  ;;  %v2064_v34 = vsub.f32 %v856_v5, %v2035_v19 }
  0xfc   :  { %v861_v43 = vmax.f32 %v841_v32, 0.0  ;;  %v835_v44 = vadd.f32 %v834_v28, %v721_v35  ;;  %v739_v45 = vadd.f32 %v1607_v39, %v623_v37  ;;  %v2013_v6 = vand.u32 4294901760, %v858_v60 }
  0xfd   :  { %v732_v33 = vpop.f32.mrf.mxu0  ;;  %v846_v49 = vpop.f32.mrf.mxu1  ;;  %v2029_v16 = vsub.f32 %v859_v54, %v2001_v2  ;;  %v1021_v28 = vand.u32 4294901760, %v2051_v26  ;;  %v954_v32 = vand.u32 4294901760, %v953_v13  ;;  %v1028_v35 = vand.u32 4294901760, %v2064_v34 }
  0xfe   :  { %v733_v48 = vadd.f32 %v732_v33, %v615_v40  ;;  %v860_v51 = vmax.f32 %v835_v44, 0.0  ;;  %v853_v53 = vadd.f32 %v1621_v42, %v739_v45  ;;  %v1995_v55 = vand.u32 4294901760, %v861_v43 }
  0xff   :  { %v2040_v21 = vsub.f32 %v858_v60, %v2013_v6  ;;  %v1007_v11 = vand.u32 4294901760, %v2029_v16  ;;  %v1022_v40 = vsub.f32 %v2051_v26, %v1021_v28  ;;  %v1029_v42 = vsub.f32 %v2064_v34, %v1028_v35 }
 0x100   :  { %v847_v52 = vadd.f32 %v846_v49, %v733_v48  ;;  %v863_v57 = vmax.f32 %v853_v53, 0.0  ;;  %v1999_v61 = vand.u32 4294901760, %v860_v51  ;;  %v2004_v58 = vsub.f32 %v861_v43, %v1995_v55  ;;  %v867_v53 = vpop.permute.xlu0 %866 }
 0x101   :  { %v1014_v36 = vand.u32 4294901760, %v2040_v21  ;;  %v1008_v37 = vsub.f32 %v2029_v16, %v1007_v11  ;;  %v1023_v43 = vand.u32 4294901760, %v1022_v40  ;;  %v1030_v44 = vand.u32 4294901760, %v1029_v42 }
 0x102   :  { %v862_v62 = vmax.f32 %v847_v52, 0.0  ;;  %v875_v0 = vsel %vm873_vm4, %v863_v57, 0  ;;  %v2016_v7 = vsub.f32 %v860_v51, %v1999_v61  ;;  %v993_v12 = vand.u32 4294901760, %v2004_v58 }
 0x103   :  { %v2006_v3 = vand.u32 4294901760, %v875_v0  ;;  %v1015_v39 = vsub.f32 %v2040_v21, %v1014_v36  ;;  %v1009_v41 = vand.u32 4294901760, %v1008_v37 }
 0x104   :  { %v2008_v4 = vand.u32 4294901760, %v862_v62  ;;  %v1000_v17 = vand.u32 4294901760, %v2016_v7  ;;  %v994_v22 = vsub.f32 %v2004_v58, %v993_v12 }
 0x105   :  { %v2019_v8 = vsub.f32 %v875_v0, %v2006_v3  ;;  %1623 = vmatpush3.msra.mxu0 %v2006_v3  ;;  %v1016_v30 = vand.u32 4294901760, %v1015_v39 }
 0x106   :  { %v2022_v10 = vsub.f32 %v862_v62, %v2008_v4  ;;  %1624 = vmatprep.subr.mxu0 %v1765_v9  ;;  %v1001_v25 = vsub.f32 %v2016_v7, %v1000_v17  ;;  %v995_v27 = vand.u32 4294901760, %v994_v22 }
 0x107   :  { %v979_v15 = vand.u32 4294901760, %v2019_v8  ;;  %1625 = vmatpush3.msra.mxu0 %v2008_v4 }
 0x108   :  { %v986_v18 = vand.u32 4294901760, %v2022_v10  ;;  %1626 = vmatprep.subr.mxu0 %v1765_v9  ;;  %v1002_v38 = vand.u32 4294901760, %v1001_v25 }
 0x109   :  { %1627 = vmatpush3.msra.mxu0 %v1995_v55  ;;  %v980_v24 = vsub.f32 %v2019_v8, %v979_v15 }
 0x10a   :  { %v987_v23 = vsub.f32 %v2022_v10, %v986_v18  ;;  %1628 = vmatprep.subr.mxu0 %v1765_v9 }
 0x10b   :  { %1629 = vmatpush3.msra.mxu0 %v1999_v61  ;;  %v981_v29 = vand.u32 4294901760, %v980_v24 }
 0x10c   :  { %v988_v31 = vand.u32 4294901760, %v987_v23  ;;  %1630 = vmatprep.subr.mxu0 %v1765_v9 }
 0x10d   :  { %1631 = vmatpush3.msra.mxu0 %v2001_v2  ;;  %1642 = vmatpush3.msra.mxu1 %v981_v29 }
 0x10e   :  { %1632 = vmatprep.subr.mxu0 %v1765_v9  ;;  %1643 = vmatprep.subr.mxu1 %v1765_v9 }
 0x10f   :  { %1633 = vmatpush3.msra.mxu0 %v2013_v6  ;;  %1644 = vmatpush3.msra.mxu1 %v988_v31 }
 0x110   :  { %1634 = vmatprep.subr.mxu0 %v1765_v9  ;;  %1645 = vmatprep.subr.mxu1 %v1765_v9 }
 0x111   :  { %1635 = vmatpush3.msra.mxu0 %v2025_v14  ;;  %1646 = vmatpush3.msra.mxu1 %v995_v27 }
 0x112   :  { %1636 = vmatprep.subr.mxu0 %v1765_v9  ;;  %1647 = vmatprep.subr.mxu1 %v1765_v9 }
 0x113   :  { %1637 = vmatpush3.msra.mxu0 %v2035_v19  ;;  %1648 = vmatpush3.msra.mxu1 %v1002_v38 }
 0x114   :  { %1639 = vmatmul.mubr.f32.vlgmr.msra.gmra.mxu0 %v954_v32  ;;  %1649 = vmatprep.subr.mxu1 %v1765_v9 }
 0x115   :  { %1660 = vmatprep.subr.mxu0 %v1765_v9  ;;  %1650 = vmatpush3.msra.mxu1 %v1009_v41 }
 0x116   :  { %1661 = vmatpush3.msra.mxu0 %v2019_v8  ;;  %1651 = vmatprep.subr.mxu1 %v1765_v9 }
 0x117   :  { %1662 = vmatprep.subr.mxu0 %v1765_v9  ;;  %1652 = vmatpush3.msra.mxu1 %v1016_v30 }
 0x118   :  { %1663 = vmatpush3.msra.mxu0 %v2022_v10  ;;  %1653 = vmatprep.subr.mxu1 %v1765_v9 }
 0x119   :  { %1664 = vmatprep.subr.mxu0 %v1765_v9  ;;  %1654 = vmatpush3.msra.mxu1 %v1023_v43 }
 0x11a   :  { %1665 = vmatpush3.msra.mxu0 %v2004_v58  ;;  %1655 = vmatprep.subr.mxu1 %v1765_v9 }
 0x11b   :  { %1666 = vmatprep.subr.mxu0 %v1765_v9  ;;  %1656 = vmatpush3.msra.mxu1 %v1030_v44 }
 0x11c   :  { %1667 = vmatpush3.msra.mxu0 %v2016_v7  ;;  %1658 = vmatmul.mubr.f32.vlgmr.msra.gmra.mxu1 %v1997_v59 }
 0x11d   :  { %1668 = vmatprep.subr.mxu0 %v1765_v9  ;;  %1679 = vmatprep.subr.mxu1 %v1765_v9 }
 0x11e   :  { %1669 = vmatpush3.msra.mxu0 %v2029_v16  ;;  %1680 = vmatpush3.msra.mxu1 %v2006_v3 }
 0x11f   :  { %1670 = vmatprep.subr.mxu0 %v1765_v9  ;;  %1681 = vmatprep.subr.mxu1 %v1765_v9 }
 0x120   :  { %1671 = vmatpush3.msra.mxu0 %v2040_v21  ;;  %1682 = vmatpush3.msra.mxu1 %v2008_v4 }
 0x121   :  { %1672 = vmatprep.subr.mxu0 %v1765_v9  ;;  %1683 = vmatprep.subr.mxu1 %v1765_v9 }
 0x122   :  { %1673 = vmatpush3.msra.mxu0 %v2051_v26  ;;  %1684 = vmatpush3.msra.mxu1 %v1995_v55 }
 0x123   :  { %1674 = vmatprep.subr.mxu0 %v1765_v9  ;;  %1685 = vmatprep.subr.mxu1 %v1765_v9 }
 0x124   :  { %1675 = vmatpush3.msra.mxu0 %v2064_v34  ;;  %1676 = vmatprep.mubr.msk.f32.mxu0 %vm1766_vm2, %v1765_v9 }
 0x125   :  { %1686 = vmatpush3.msra.mxu1 %v1999_v61  ;;  %1677 = vmatmul.mubr.f32.vlgmr.msra.gmra.mxu0 %v2011_v1 }
 0x126   :  { %1687 = vmatprep.subr.mxu1 %v1765_v9  ;;  %1698 = vmatprep.subr.mxu0 %v1765_v9 }
 0x127   :  { %1688 = vmatpush3.msra.mxu1 %v2001_v2  ;;  %1699 = vmatpush3.msra.mxu0 %v979_v15 }
 0x128   :  { %1689 = vmatprep.subr.mxu1 %v1765_v9  ;;  %1700 = vmatprep.subr.mxu0 %v1765_v9 }
 0x129   :  { %1690 = vmatpush3.msra.mxu1 %v2013_v6  ;;  %1701 = vmatpush3.msra.mxu0 %v986_v18 }
 0x12a   :  { %1691 = vmatprep.subr.mxu1 %v1765_v9  ;;  %1702 = vmatprep.subr.mxu0 %v1765_v9 }
 0x12b   :  { %1692 = vmatpush3.msra.mxu1 %v2025_v14  ;;  %1703 = vmatpush3.msra.mxu0 %v993_v12 }
 0x12c   :  { %1693 = vmatprep.subr.mxu1 %v1765_v9  ;;  %1704 = vmatprep.subr.mxu0 %v1765_v9 }
 0x12d   :  { %1694 = vmatpush3.msra.mxu1 %v2035_v19  ;;  %1695 = vmatprep.mubr.msk.f32.mxu1 %vm1766_vm2, %v1765_v9 }
 0x12e   :  { %1705 = vmatpush3.msra.mxu0 %v1000_v17  ;;  %1696 = vmatmul.mubr.f32.vlgmr.msra.gmra.mxu1 %v952_v20 }
 0x12f   :  { %1706 = vmatprep.subr.mxu0 %v1765_v9  ;;  %1717 = vmatprep.subr.mxu1 %v1765_v9 }
 0x130   :  { %1707 = vmatpush3.msra.mxu0 %v1007_v11  ;;  %1718 = vmatpush3.msra.mxu1 %v2006_v3 }
 0x131   :  { %1708 = vmatprep.subr.mxu0 %v1765_v9  ;;  %1719 = vmatprep.subr.mxu1 %v1765_v9 }
 0x132   :  { %1709 = vmatpush3.msra.mxu0 %v1014_v36  ;;  %1720 = vmatpush3.msra.mxu1 %v2008_v4 }
 0x133   :  { %1710 = vmatprep.subr.mxu0 %v1765_v9  ;;  %1721 = vmatprep.subr.mxu1 %v1765_v9 }
 0x134   :  { %1711 = vmatpush3.msra.mxu0 %v1021_v28  ;;  %1722 = vmatpush3.msra.mxu1 %v1995_v55 }
 0x135   :  { %1712 = vmatprep.subr.mxu0 %v1765_v9  ;;  %1723 = vmatprep.subr.mxu1 %v1765_v9 }
 0x136   :  { %1713 = vmatpush3.msra.mxu0 %v1028_v35  ;;  %1714 = vmatprep.mubr.msk.f32.mxu0 %vm1766_vm2, %v1765_v9 }
 0x137   :  { %1724 = vmatpush3.msra.mxu1 %v1999_v61  ;;  %1715 = vmatmul.mubr.f32.vlgmr.msra.gmra.mxu0 %v1997_v59 }
 0x138   :  { %1725 = vmatprep.subr.mxu1 %v1765_v9  ;;  %1733 = vmatprep.mubr.msk.f32.mxu1 %vm1766_vm2, %v1765_v9 }
 0x139   :  { %1726 = vmatpush3.msra.mxu1 %v2001_v2 }
 0x13a   :  { %1727 = vmatprep.subr.mxu1 %v1765_v9 }
 0x13b   :  { %1728 = vmatpush3.msra.mxu1 %v2013_v6 }
 0x13c   :  { %1729 = vmatprep.subr.mxu1 %v1765_v9 }
 0x13d   :  { %1730 = vmatpush3.msra.mxu1 %v2025_v14 }
 0x13e   :  { %1731 = vmatprep.subr.mxu1 %v1765_v9 }
 0x13f   :  { %1732 = vmatpush3.msra.mxu1 %v2035_v19 }
 0x140   :  { %1734 = vmatmul.mubr.f32.vlgmr.msra.gmra.mxu1 %v1997_v59 }
 0x1d4   :  { %v956_v45 = vpop.f32.mrf.mxu0 }
 0x1d5   :  { %v957_v54 = vadd.f32 %v956_v45, %v867_v53 }
 0x1d6   :  { %v1640_v33 = vpop.f32.mrf.mxu0 }
 0x1dc   :  { %v1067_v46 = vpop.f32.mrf.mxu1 }
 0x1dd   :  { %v1068_v52 = vadd.f32 %v1067_v46, %v957_v54 }
 0x1de   :  { %v1659_v48 = vpop.f32.mrf.mxu1 }
 0x1e5   :  { %v1155_v49 = vpop.f32.mrf.mxu0 }
 0x1e6   :  { %v1156_v57 = vadd.f32 %v1155_v49, %v1068_v52 }
 0x1e7   :  { %v1678_v47 = vpop.f32.mrf.mxu0 }
 0x1ee   :  { %v1236_v50 = vpop.f32.mrf.mxu1 }
 0x1ef   :  { %v1237_v60 = vadd.f32 %v1236_v50, %v1156_v57 }
 0x1f0   :  { %v1697_v51 = vpop.f32.mrf.mxu1 }
 0x1f7   :  { %v1331_v55 = vpop.f32.mrf.mxu0 }
 0x1f8   :  { %v1332_v9 = vadd.f32 %v1331_v55, %v1237_v60 }
 0x1f9   :  { %v1716_v56 = vpop.f32.mrf.mxu0 }
 0x200   :  { %v1410_v61 = vpop.f32.mrf.mxu1 }
 0x201   :  { %v1411_v59 = vadd.f32 %v1410_v61, %v1332_v9 }
 0x202   :  { %v1735_v62 = vpop.f32.mrf.mxu1 }
 0x203   :  { %1415 = vst.msk [vmem:[#allocation2] sm:$0x3] %vm1414_vm5, %v1411_v59 }
 0x204   :  { %1753 = shalt.err (!%p1750_p4)
}
 0x205   :  { %1425 = dma.vmem_to_hbm [thread:$0]  %s1423_s26, 32, %s2192_s5, [#allocation3]  }
 0x206   :  { %1762 = dma.done.wait [#allocation3], 32  }
 0x207   :  { %1763 = vsyncadd [#allocation3], 4294967264 }
 0x208   :  { %1429 = vsyncpa [#allocation3], 1 }

</bundles_post_ra>
